<compile_context>
chip_gen: v7x
topology: tpu7x:2x2x1
jax: 0.10.0
libtpu: 0.0.40
codegen_flags: <defaults>
</compile_context>

<pallas_src>
import jax
import jax.numpy as jnp
from jax.experimental import pallas as pl
from jax.experimental.pallas import tpu as pltpu


# ----------------------------------------------------------------------------
# Fused kernel: FC embed + obs-gate hoist + fully-unrolled 2-layer LSTM
# ----------------------------------------------------------------------------
def make_nn_fused_kernel(T, B, H):
    def kernel(obs_ref, val_ref, fc_w_ref, fc_b_ref,
               w0_ref, wi0_obs_ref, b0_ref, w1_ref, b1_ref, out_ref):
        # ---- 1) ObserveEmbeddingFC: Linear + ReLU --------------------- (B,E)
        obs_embed = jnp.maximum(
            jnp.dot(obs_ref[...], fc_w_ref[...],
                    preferred_element_type=jnp.float32) + fc_b_ref[...],
            0.0,
        )

        # ---- 2) hoisted, time-invariant obs contribution to layer-0 gates
        #        obs_gates = obs_embed @ wi0[E:, :] + (b_ih0 + b_hh0)  (B,4H)
        obs_gates = (
            jnp.dot(obs_embed, wi0_obs_ref[...],
                    preferred_element_type=jnp.float32) + b0_ref[...]
        )

        # Lane mask selecting the g-gate range [2H, 3H) of the (B, 4H) vreg.
        lane = jax.lax.broadcasted_iota(jnp.int32, (B, 4 * H), 1)
        g_mask = (lane >= 2 * H) & (lane < 3 * H)

        def gate_act(gates):
            # Whole-vreg activations (one sigmoid + one tanh EUP pass), then
            # slice the already-activated gates. PyTorch gate order: i,f,g,o.
            act = jnp.where(g_mask, jnp.tanh(gates), jax.nn.sigmoid(gates))
            return (act[:, 0:H], act[:, H:2 * H],
                    act[:, 2 * H:3 * H], act[:, 3 * H:4 * H])

        h0 = jnp.zeros((B, H), jnp.float32)   # previous_hidden is None
        c0 = jnp.zeros((B, H), jnp.float32)
        h1 = jnp.zeros((B, H), jnp.float32)
        c1 = jnp.zeros((B, H), jnp.float32)

        outs = []
        for t in range(T):                    # static T -> fully unrolled
            # -- layer 0: one matmul on stacked [value_t | h0_prev] weights
            x0 = jnp.concatenate([val_ref[t], h0], axis=-1)        # (B, E+H)
            gates0 = (jnp.dot(x0, w0_ref[...],
                              preferred_element_type=jnp.float32)
                      + obs_gates)
            i0, f0, g0, o0 = gate_act(gates0)
            c0 = f0 * c0 + i0 * g0
            h0 = o0 * jnp.tanh(c0)

            # -- layer 1: one matmul on stacked [h0 | h1_prev] weights
            x1 = jnp.concatenate([h0, h1], axis=-1)                # (B, 2H)
            gates1 = (jnp.dot(x1, w1_ref[...],
                              preferred_element_type=jnp.float32)
                      + b1_ref[...])
            i1, f1, g1, o1 = gate_act(gates1)
            c1 = f1 * c1 + i1 * g1
            h1 = o1 * jnp.tanh(c1)
            outs.append(h1)

        # Single store at the end (no per-step partial writebacks).
        out_ref[...] = jnp.stack(outs, axis=0).astype(out_ref.dtype)

    return kernel


# ----------------------------------------------------------------------------
# NN.forward equivalent (dense, single-subbatch version)
# ----------------------------------------------------------------------------
def nn_forward(obs, value_embeds, params):
    """obs: (B, obs_numel); value_embeds: (T, B, E) with step-0 row == zeros
    (previous_sample is None).  Returns LSTM output (T, B, E)."""
    B, _ = obs.shape
    T, _, E = value_embeds.shape
    H = params["wh0"].shape[0]

    # Weight prep (once, outside the kernel): split wi0 into the value / obs
    # halves and pre-stack [input ; recurrent] so each cell is one matmul.
    wi0_val = params["wi0"][:E]                      # multiplies value_embed_t
    wi0_obs = params["wi0"][E:]                      # multiplies obs_embed
    w0_stk = jnp.concatenate([wi0_val, params["wh0"]], axis=0)        # (E+H,4H)
    w1_stk = jnp.concatenate([params["wi1"], params["wh1"]], axis=0)  # (2H,4H)

    kernel = make_nn_fused_kernel(T, B, H)

    def full(shape):
        n = len(shape)
        return pl.BlockSpec(shape, lambda i: (0,) * n)

    return pl.pallas_call(
        kernel,
        out_shape=jax.ShapeDtypeStruct((T, B, H), jnp.float32),
        grid_spec=pltpu.PrefetchScalarGridSpec(
            num_scalar_prefetch=0,
            grid=(1,),
            in_specs=[
                full(obs.shape),
                full(value_embeds.shape),
                full(params["fc_w"].shape),
                full(params["fc_b"].shape),
                full(w0_stk.shape),
                full(wi0_obs.shape),
                full(params["b0"].shape),
                full(w1_stk.shape),
                full(params["b1"].shape),
            ],
            out_specs=full((T, B, H)),
        ),
        compiler_params=pltpu.CompilerParams(
            dimension_semantics=("arbitrary",)
        ),
    )(obs, value_embeds, params["fc_w"], params["fc_b"],
      w0_stk, wi0_obs, params["b0"], w1_stk, params["b1"])


# ----------------------------------------------------------------------------
# Pure-JAX reference (unfused semantics of the original module)
# ----------------------------------------------------------------------------
def lstm_ref(x, wi0, wh0, b0, wi1, wh1, b1):
    T, B, _ = x.shape
    H = wh0.shape[0]

    def cell(x_t, h, c, wi, wh, b):
        g = x_t @ wi + h @ wh + b
        i = jax.nn.sigmoid(g[:, 0:H])
        f = jax.nn.sigmoid(g[:, H:2 * H])
        gg = jnp.tanh(g[:, 2 * H:3 * H])
        o = jax.nn.sigmoid(g[:, 3 * H:4 * H])
        c = f * c + i * gg
        h = o * jnp.tanh(c)
        return h, c

    h0 = c0 = h1 = c1 = jnp.zeros((B, H), jnp.float32)
    outs = []
    for t in range(T):
        h0, c0 = cell(x[t], h0, c0, wi0, wh0, b0)
        h1, c1 = cell(h0, h1, c1, wi1, wh1, b1)
        outs.append(h1)
    return jnp.stack(outs, axis=0)


if __name__ == "__main__":
    # embedding_dim (settings.embedding_dim) chosen small; 4H = 128 = lane width
    E = 32            # embedding / LSTM hidden dim
    H = E
    T = 4             # number of sample steps in the trace
    B = 8             # subbatch size
    OBS_NUMEL = 16    # flattened observation size (ObserveEmbeddingFC input)

    key = jax.random.PRNGKey(0)
    ks = jax.random.split(key, 10)
    s = 0.1

    params = {
        # ObserveEmbeddingFC: Linear(OBS_NUMEL -> E) + ReLU
        "fc_w": s * jax.random.normal(ks[0], (OBS_NUMEL, E), jnp.float32),
        "fc_b": s * jax.random.normal(ks[1], (1, E), jnp.float32),
        # LSTM layer 0: input 2E, hidden H (weights stored pre-transposed,
        # PyTorch gate order i,f,g,o; b = b_ih + b_hh)
        "wi0": s * jax.random.normal(ks[2], (2 * E, 4 * H), jnp.float32),
        "wh0": s * jax.random.normal(ks[3], (H, 4 * H), jnp.float32),
        "b0": s * jax.random.normal(ks[4], (1, 4 * H), jnp.float32),
        # LSTM layer 1: input H, hidden H
        "wi1": s * jax.random.normal(ks[5], (H, 4 * H), jnp.float32),
        "wh1": s * jax.random.normal(ks[6], (H, 4 * H), jnp.float32),
        "b1": s * jax.random.normal(ks[7], (1, 4 * H), jnp.float32),
    }

    obs = jax.random.normal(ks[8], (B, OBS_NUMEL), jnp.float32)

    # value embeds: step 0 is zeros (previous_sample is None); later steps stand
    # in for the dynamically-added per-address embedding layers.
    value_rest = jax.random.normal(ks[9], (T - 1, B, E), jnp.float32)
    value_embeds = jnp.concatenate(
        [jnp.zeros((1, B, E), jnp.float32), value_rest], axis=0
    )

    out = nn_forward(obs, value_embeds, params)
    out = jax.block_until_ready(out)
    assert out.shape == (T, B, H), out.shape

    # sanity check against the unfused pure-JAX reference
    obs_embed_ref = jnp.maximum(obs @ params["fc_w"] + params["fc_b"], 0.0)
    lstm_in_ref = jnp.concatenate(
        [value_embeds, jnp.broadcast_to(obs_embed_ref[None], (T, B, E))], axis=-1
    )
    ref = lstm_ref(
        lstm_in_ref,
        params["wi0"], params["wh0"], params["b0"],
        params["wi1"], params["wh1"], params["b1"],
    )
    assert jnp.allclose(out, ref, atol=1e-4, rtol=1e-4), (
        float(jnp.max(jnp.abs(out - ref)))
    )

    print("KERNEL_OK")
</pallas_src>

<mosaic_0001>
module attributes {stable_mosaic.version = 11 : i64} {
  func.func @kernel(%arg0: i32, %arg1: memref<8x16xf32, #tpu.memory_space<vmem>>, %arg2: memref<4x8x32xf32, #tpu.memory_space<vmem>>, %arg3: memref<16x32xf32, #tpu.memory_space<vmem>>, %arg4: memref<1x32xf32, #tpu.memory_space<vmem>>, %arg5: memref<64x128xf32, #tpu.memory_space<vmem>>, %arg6: memref<32x128xf32, #tpu.memory_space<vmem>>, %arg7: memref<1x128xf32, #tpu.memory_space<vmem>>, %arg8: memref<64x128xf32, #tpu.memory_space<vmem>>, %arg9: memref<1x128xf32, #tpu.memory_space<vmem>>, %arg10: memref<4x8x32xf32, #tpu.memory_space<vmem>>) attributes {dimension_semantics = [#tpu.dimension_semantics<arbitrary>], iteration_bounds = array<i64: 1>, scalar_prefetch = 0 : i64, scratch_operands = 0 : i64, tpu.core_type = #tpu.core_type<tc>, window_params = [{pipeline_mode = #tpu.pipeline_mode<synchronous>, transform_indices = @transform_0, window_bounds = array<i64: 8, 16>}, {pipeline_mode = #tpu.pipeline_mode<synchronous>, transform_indices = @transform_1, window_bounds = array<i64: 4, 8, 32>}, {pipeline_mode = #tpu.pipeline_mode<synchronous>, transform_indices = @transform_2, window_bounds = array<i64: 16, 32>}, {pipeline_mode = #tpu.pipeline_mode<synchronous>, transform_indices = @transform_3, window_bounds = array<i64: 1, 32>}, {pipeline_mode = #tpu.pipeline_mode<synchronous>, transform_indices = @transform_4, window_bounds = array<i64: 64, 128>}, {pipeline_mode = #tpu.pipeline_mode<synchronous>, transform_indices = @transform_5, window_bounds = array<i64: 32, 128>}, {pipeline_mode = #tpu.pipeline_mode<synchronous>, transform_indices = @transform_6, window_bounds = array<i64: 1, 128>}, {pipeline_mode = #tpu.pipeline_mode<synchronous>, transform_indices = @transform_7, window_bounds = array<i64: 64, 128>}, {pipeline_mode = #tpu.pipeline_mode<synchronous>, transform_indices = @transform_8, window_bounds = array<i64: 1, 128>}, {pipeline_mode = #tpu.pipeline_mode<synchronous>, transform_indices = @transform_9, window_bounds = array<i64: 4, 8, 32>}]} {
    %c0 = arith.constant 0 : index
    %c0_0 = arith.constant 0 : index
    %0 = vector.load %arg1[%c0, %c0_0] : memref<8x16xf32, #tpu.memory_space<vmem>>, vector<8x16xf32>
    %c0_1 = arith.constant 0 : index
    %c0_2 = arith.constant 0 : index
    %1 = vector.load %arg3[%c0_1, %c0_2] : memref<16x32xf32, #tpu.memory_space<vmem>>, vector<16x32xf32>
    %cst = arith.constant dense<0.000000e+00> : vector<8x32xf32>
    %2 = tpu.matmul %0, %1, %cst {dimension_numbers = #tpu.dot_dimension_numbers<[1], [0], [0], [1], [0, 0, 1, 1], [], []>} : vector<8x16xf32>, vector<16x32xf32>, vector<8x32xf32> -> vector<8x32xf32>
    %c0_3 = arith.constant 0 : index
    %c0_4 = arith.constant 0 : index
    %3 = vector.load %arg4[%c0_3, %c0_4] : memref<1x32xf32, #tpu.memory_space<vmem>>, vector<1x32xf32>
    %4 = vector.broadcast %3 : vector<1x32xf32> to vector<8x32xf32>
    %5 = arith.addf %2, %4 : vector<8x32xf32>
    %cst_5 = arith.constant 0.000000e+00 : f32
    %6 = vector.broadcast %cst_5 : f32 to vector<8x32xf32>
    %7 = arith.maximumf %5, %6 : vector<8x32xf32>
    %c0_6 = arith.constant 0 : index
    %c0_7 = arith.constant 0 : index
    %8 = vector.load %arg6[%c0_6, %c0_7] : memref<32x128xf32, #tpu.memory_space<vmem>>, vector<32x128xf32>
    %cst_8 = arith.constant dense<0.000000e+00> : vector<8x128xf32>
    %9 = tpu.matmul %7, %8, %cst_8 {dimension_numbers = #tpu.dot_dimension_numbers<[1], [0], [0], [1], [0, 0, 1, 1], [], []>} : vector<8x32xf32>, vector<32x128xf32>, vector<8x128xf32> -> vector<8x128xf32>
    %c0_9 = arith.constant 0 : index
    %c0_10 = arith.constant 0 : index
    %10 = vector.load %arg7[%c0_9, %c0_10] : memref<1x128xf32, #tpu.memory_space<vmem>>, vector<1x128xf32>
    %11 = vector.broadcast %10 : vector<1x128xf32> to vector<8x128xf32>
    %12 = arith.addf %9, %11 : vector<8x128xf32>
    %13 = tpu.iota {dimensions = array<i32: 1>} : vector<8x128xi32>
    %c64_i32 = arith.constant 64 : i32
    %14 = vector.broadcast %c64_i32 : i32 to vector<8x128xi32>
    %15 = arith.cmpi sge, %13, %14 : vector<8x128xi32>
    %c96_i32 = arith.constant 96 : i32
    %16 = vector.broadcast %c96_i32 : i32 to vector<8x128xi32>
    %17 = arith.cmpi slt, %13, %16 : vector<8x128xi32>
    %18 = arith.andi %15, %17 : vector<8x128xi1>
    %cst_11 = arith.constant 0.000000e+00 : f32
    %19 = vector.broadcast %cst_11 : f32 to vector<8x32xf32>
    %cst_12 = arith.constant 0.000000e+00 : f32
    %20 = vector.broadcast %cst_12 : f32 to vector<8x32xf32>
    %cst_13 = arith.constant 0.000000e+00 : f32
    %21 = vector.broadcast %cst_13 : f32 to vector<8x32xf32>
    %cst_14 = arith.constant 0.000000e+00 : f32
    %22 = vector.broadcast %cst_14 : f32 to vector<8x32xf32>
    %c0_15 = arith.constant 0 : index
    %c0_16 = arith.constant 0 : index
    %c0_17 = arith.constant 0 : index
    %23 = vector.load %arg2[%c0_15, %c0_16, %c0_17] : memref<4x8x32xf32, #tpu.memory_space<vmem>>, vector<1x8x32xf32>
    %24 = vector.shape_cast %23 : vector<1x8x32xf32> to vector<8x32xf32>
    %25 = tpu.concatenate %24, %19 in 1 : vector<8x32xf32>, vector<8x32xf32> -> vector<8x64xf32>
    %c0_18 = arith.constant 0 : index
    %c0_19 = arith.constant 0 : index
    %26 = vector.load %arg5[%c0_18, %c0_19] : memref<64x128xf32, #tpu.memory_space<vmem>>, vector<64x128xf32>
    %cst_20 = arith.constant dense<0.000000e+00> : vector<8x128xf32>
    %27 = tpu.matmul %25, %26, %cst_20 {dimension_numbers = #tpu.dot_dimension_numbers<[1], [0], [0], [1], [0, 0, 1, 1], [], []>} : vector<8x64xf32>, vector<64x128xf32>, vector<8x128xf32> -> vector<8x128xf32>
    %28 = arith.addf %27, %12 : vector<8x128xf32>
    %29 = math.tanh %28 : vector<8x128xf32>
    %30 = arith.negf %28 : vector<8x128xf32>
    %31 = math.exp %30 : vector<8x128xf32>
    %cst_21 = arith.constant 1.000000e+00 : f32
    %32 = vector.broadcast %cst_21 : f32 to vector<8x128xf32>
    %33 = arith.addf %32, %31 : vector<8x128xf32>
    %34 = arith.divf %32, %33 : vector<8x128xf32>
    %35 = arith.select %18, %29, %34 : vector<8x128xi1>, vector<8x128xf32>
    %36 = vector.extract_strided_slice %35 {offsets = [0, 0], sizes = [8, 32], strides = [1, 1]} : vector<8x128xf32> to vector<8x32xf32>
    %37 = vector.extract_strided_slice %35 {offsets = [0, 32], sizes = [8, 32], strides = [1, 1]} : vector<8x128xf32> to vector<8x32xf32>
    %38 = vector.extract_strided_slice %35 {offsets = [0, 64], sizes = [8, 32], strides = [1, 1]} : vector<8x128xf32> to vector<8x32xf32>
    %39 = vector.extract_strided_slice %35 {offsets = [0, 96], sizes = [8, 32], strides = [1, 1]} : vector<8x128xf32> to vector<8x32xf32>
    %40 = arith.mulf %37, %20 : vector<8x32xf32>
    %41 = arith.mulf %36, %38 : vector<8x32xf32>
    %42 = arith.addf %40, %41 : vector<8x32xf32>
    %43 = math.tanh %42 : vector<8x32xf32>
    %44 = arith.mulf %39, %43 : vector<8x32xf32>
    %45 = tpu.concatenate %44, %21 in 1 : vector<8x32xf32>, vector<8x32xf32> -> vector<8x64xf32>
    %c0_22 = arith.constant 0 : index
    %c0_23 = arith.constant 0 : index
    %46 = vector.load %arg8[%c0_22, %c0_23] : memref<64x128xf32, #tpu.memory_space<vmem>>, vector<64x128xf32>
    %cst_24 = arith.constant dense<0.000000e+00> : vector<8x128xf32>
    %47 = tpu.matmul %45, %46, %cst_24 {dimension_numbers = #tpu.dot_dimension_numbers<[1], [0], [0], [1], [0, 0, 1, 1], [], []>} : vector<8x64xf32>, vector<64x128xf32>, vector<8x128xf32> -> vector<8x128xf32>
    %c0_25 = arith.constant 0 : index
    %c0_26 = arith.constant 0 : index
    %48 = vector.load %arg9[%c0_25, %c0_26] : memref<1x128xf32, #tpu.memory_space<vmem>>, vector<1x128xf32>
    %49 = vector.broadcast %48 : vector<1x128xf32> to vector<8x128xf32>
    %50 = arith.addf %47, %49 : vector<8x128xf32>
    %51 = math.tanh %50 : vector<8x128xf32>
    %52 = arith.negf %50 : vector<8x128xf32>
    %53 = math.exp %52 : vector<8x128xf32>
    %cst_27 = arith.constant 1.000000e+00 : f32
    %54 = vector.broadcast %cst_27 : f32 to vector<8x128xf32>
    %55 = arith.addf %54, %53 : vector<8x128xf32>
    %56 = arith.divf %54, %55 : vector<8x128xf32>
    %57 = arith.select %18, %51, %56 : vector<8x128xi1>, vector<8x128xf32>
    %58 = vector.extract_strided_slice %57 {offsets = [0, 0], sizes = [8, 32], strides = [1, 1]} : vector<8x128xf32> to vector<8x32xf32>
    %59 = vector.extract_strided_slice %57 {offsets = [0, 32], sizes = [8, 32], strides = [1, 1]} : vector<8x128xf32> to vector<8x32xf32>
    %60 = vector.extract_strided_slice %57 {offsets = [0, 64], sizes = [8, 32], strides = [1, 1]} : vector<8x128xf32> to vector<8x32xf32>
    %61 = vector.extract_strided_slice %57 {offsets = [0, 96], sizes = [8, 32], strides = [1, 1]} : vector<8x128xf32> to vector<8x32xf32>
    %62 = arith.mulf %59, %22 : vector<8x32xf32>
    %63 = arith.mulf %58, %60 : vector<8x32xf32>
    %64 = arith.addf %62, %63 : vector<8x32xf32>
    %65 = math.tanh %64 : vector<8x32xf32>
    %66 = arith.mulf %61, %65 : vector<8x32xf32>
    %c1 = arith.constant 1 : index
    %c0_28 = arith.constant 0 : index
    %c0_29 = arith.constant 0 : index
    %67 = vector.load %arg2[%c1, %c0_28, %c0_29] : memref<4x8x32xf32, #tpu.memory_space<vmem>>, vector<1x8x32xf32>
    %68 = vector.shape_cast %67 : vector<1x8x32xf32> to vector<8x32xf32>
    %69 = tpu.concatenate %68, %44 in 1 : vector<8x32xf32>, vector<8x32xf32> -> vector<8x64xf32>
    %c0_30 = arith.constant 0 : index
    %c0_31 = arith.constant 0 : index
    %70 = vector.load %arg5[%c0_30, %c0_31] : memref<64x128xf32, #tpu.memory_space<vmem>>, vector<64x128xf32>
    %cst_32 = arith.constant dense<0.000000e+00> : vector<8x128xf32>
    %71 = tpu.matmul %69, %70, %cst_32 {dimension_numbers = #tpu.dot_dimension_numbers<[1], [0], [0], [1], [0, 0, 1, 1], [], []>} : vector<8x64xf32>, vector<64x128xf32>, vector<8x128xf32> -> vector<8x128xf32>
    %72 = arith.addf %71, %12 : vector<8x128xf32>
    %73 = math.tanh %72 : vector<8x128xf32>
    %74 = arith.negf %72 : vector<8x128xf32>
    %75 = math.exp %74 : vector<8x128xf32>
    %cst_33 = arith.constant 1.000000e+00 : f32
    %76 = vector.broadcast %cst_33 : f32 to vector<8x128xf32>
    %77 = arith.addf %76, %75 : vector<8x128xf32>
    %78 = arith.divf %76, %77 : vector<8x128xf32>
    %79 = arith.select %18, %73, %78 : vector<8x128xi1>, vector<8x128xf32>
    %80 = vector.extract_strided_slice %79 {offsets = [0, 0], sizes = [8, 32], strides = [1, 1]} : vector<8x128xf32> to vector<8x32xf32>
    %81 = vector.extract_strided_slice %79 {offsets = [0, 32], sizes = [8, 32], strides = [1, 1]} : vector<8x128xf32> to vector<8x32xf32>
    %82 = vector.extract_strided_slice %79 {offsets = [0, 64], sizes = [8, 32], strides = [1, 1]} : vector<8x128xf32> to vector<8x32xf32>
    %83 = vector.extract_strided_slice %79 {offsets = [0, 96], sizes = [8, 32], strides = [1, 1]} : vector<8x128xf32> to vector<8x32xf32>
    %84 = arith.mulf %81, %42 : vector<8x32xf32>
    %85 = arith.mulf %80, %82 : vector<8x32xf32>
    %86 = arith.addf %84, %85 : vector<8x32xf32>
    %87 = math.tanh %86 : vector<8x32xf32>
    %88 = arith.mulf %83, %87 : vector<8x32xf32>
    %89 = tpu.concatenate %88, %66 in 1 : vector<8x32xf32>, vector<8x32xf32> -> vector<8x64xf32>
    %c0_34 = arith.constant 0 : index
    %c0_35 = arith.constant 0 : index
    %90 = vector.load %arg8[%c0_34, %c0_35] : memref<64x128xf32, #tpu.memory_space<vmem>>, vector<64x128xf32>
    %cst_36 = arith.constant dense<0.000000e+00> : vector<8x128xf32>
    %91 = tpu.matmul %89, %90, %cst_36 {dimension_numbers = #tpu.dot_dimension_numbers<[1], [0], [0], [1], [0, 0, 1, 1], [], []>} : vector<8x64xf32>, vector<64x128xf32>, vector<8x128xf32> -> vector<8x128xf32>
    %c0_37 = arith.constant 0 : index
    %c0_38 = arith.constant 0 : index
    %92 = vector.load %arg9[%c0_37, %c0_38] : memref<1x128xf32, #tpu.memory_space<vmem>>, vector<1x128xf32>
    %93 = vector.broadcast %92 : vector<1x128xf32> to vector<8x128xf32>
    %94 = arith.addf %91, %93 : vector<8x128xf32>
    %95 = math.tanh %94 : vector<8x128xf32>
    %96 = arith.negf %94 : vector<8x128xf32>
    %97 = math.exp %96 : vector<8x128xf32>
    %cst_39 = arith.constant 1.000000e+00 : f32
    %98 = vector.broadcast %cst_39 : f32 to vector<8x128xf32>
    %99 = arith.addf %98, %97 : vector<8x128xf32>
    %100 = arith.divf %98, %99 : vector<8x128xf32>
    %101 = arith.select %18, %95, %100 : vector<8x128xi1>, vector<8x128xf32>
    %102 = vector.extract_strided_slice %101 {offsets = [0, 0], sizes = [8, 32], strides = [1, 1]} : vector<8x128xf32> to vector<8x32xf32>
    %103 = vector.extract_strided_slice %101 {offsets = [0, 32], sizes = [8, 32], strides = [1, 1]} : vector<8x128xf32> to vector<8x32xf32>
    %104 = vector.extract_strided_slice %101 {offsets = [0, 64], sizes = [8, 32], strides = [1, 1]} : vector<8x128xf32> to vector<8x32xf32>
    %105 = vector.extract_strided_slice %101 {offsets = [0, 96], sizes = [8, 32], strides = [1, 1]} : vector<8x128xf32> to vector<8x32xf32>
    %106 = arith.mulf %103, %64 : vector<8x32xf32>
    %107 = arith.mulf %102, %104 : vector<8x32xf32>
    %108 = arith.addf %106, %107 : vector<8x32xf32>
    %109 = math.tanh %108 : vector<8x32xf32>
    %110 = arith.mulf %105, %109 : vector<8x32xf32>
    %c2 = arith.constant 2 : index
    %c0_40 = arith.constant 0 : index
    %c0_41 = arith.constant 0 : index
    %111 = vector.load %arg2[%c2, %c0_40, %c0_41] : memref<4x8x32xf32, #tpu.memory_space<vmem>>, vector<1x8x32xf32>
    %112 = vector.shape_cast %111 : vector<1x8x32xf32> to vector<8x32xf32>
    %113 = tpu.concatenate %112, %88 in 1 : vector<8x32xf32>, vector<8x32xf32> -> vector<8x64xf32>
    %c0_42 = arith.constant 0 : index
    %c0_43 = arith.constant 0 : index
    %114 = vector.load %arg5[%c0_42, %c0_43] : memref<64x128xf32, #tpu.memory_space<vmem>>, vector<64x128xf32>
    %cst_44 = arith.constant dense<0.000000e+00> : vector<8x128xf32>
    %115 = tpu.matmul %113, %114, %cst_44 {dimension_numbers = #tpu.dot_dimension_numbers<[1], [0], [0], [1], [0, 0, 1, 1], [], []>} : vector<8x64xf32>, vector<64x128xf32>, vector<8x128xf32> -> vector<8x128xf32>
    %116 = arith.addf %115, %12 : vector<8x128xf32>
    %117 = math.tanh %116 : vector<8x128xf32>
    %118 = arith.negf %116 : vector<8x128xf32>
    %119 = math.exp %118 : vector<8x128xf32>
    %cst_45 = arith.constant 1.000000e+00 : f32
    %120 = vector.broadcast %cst_45 : f32 to vector<8x128xf32>
    %121 = arith.addf %120, %119 : vector<8x128xf32>
    %122 = arith.divf %120, %121 : vector<8x128xf32>
    %123 = arith.select %18, %117, %122 : vector<8x128xi1>, vector<8x128xf32>
    %124 = vector.extract_strided_slice %123 {offsets = [0, 0], sizes = [8, 32], strides = [1, 1]} : vector<8x128xf32> to vector<8x32xf32>
    %125 = vector.extract_strided_slice %123 {offsets = [0, 32], sizes = [8, 32], strides = [1, 1]} : vector<8x128xf32> to vector<8x32xf32>
    %126 = vector.extract_strided_slice %123 {offsets = [0, 64], sizes = [8, 32], strides = [1, 1]} : vector<8x128xf32> to vector<8x32xf32>
    %127 = vector.extract_strided_slice %123 {offsets = [0, 96], sizes = [8, 32], strides = [1, 1]} : vector<8x128xf32> to vector<8x32xf32>
    %128 = arith.mulf %125, %86 : vector<8x32xf32>
    %129 = arith.mulf %124, %126 : vector<8x32xf32>
    %130 = arith.addf %128, %129 : vector<8x32xf32>
    %131 = math.tanh %130 : vector<8x32xf32>
    %132 = arith.mulf %127, %131 : vector<8x32xf32>
    %133 = tpu.concatenate %132, %110 in 1 : vector<8x32xf32>, vector<8x32xf32> -> vector<8x64xf32>
    %c0_46 = arith.constant 0 : index
    %c0_47 = arith.constant 0 : index
    %134 = vector.load %arg8[%c0_46, %c0_47] : memref<64x128xf32, #tpu.memory_space<vmem>>, vector<64x128xf32>
    %cst_48 = arith.constant dense<0.000000e+00> : vector<8x128xf32>
    %135 = tpu.matmul %133, %134, %cst_48 {dimension_numbers = #tpu.dot_dimension_numbers<[1], [0], [0], [1], [0, 0, 1, 1], [], []>} : vector<8x64xf32>, vector<64x128xf32>, vector<8x128xf32> -> vector<8x128xf32>
    %c0_49 = arith.constant 0 : index
    %c0_50 = arith.constant 0 : index
    %136 = vector.load %arg9[%c0_49, %c0_50] : memref<1x128xf32, #tpu.memory_space<vmem>>, vector<1x128xf32>
    %137 = vector.broadcast %136 : vector<1x128xf32> to vector<8x128xf32>
    %138 = arith.addf %135, %137 : vector<8x128xf32>
    %139 = math.tanh %138 : vector<8x128xf32>
    %140 = arith.negf %138 : vector<8x128xf32>
    %141 = math.exp %140 : vector<8x128xf32>
    %cst_51 = arith.constant 1.000000e+00 : f32
    %142 = vector.broadcast %cst_51 : f32 to vector<8x128xf32>
    %143 = arith.addf %142, %141 : vector<8x128xf32>
    %144 = arith.divf %142, %143 : vector<8x128xf32>
    %145 = arith.select %18, %139, %144 : vector<8x128xi1>, vector<8x128xf32>
    %146 = vector.extract_strided_slice %145 {offsets = [0, 0], sizes = [8, 32], strides = [1, 1]} : vector<8x128xf32> to vector<8x32xf32>
    %147 = vector.extract_strided_slice %145 {offsets = [0, 32], sizes = [8, 32], strides = [1, 1]} : vector<8x128xf32> to vector<8x32xf32>
    %148 = vector.extract_strided_slice %145 {offsets = [0, 64], sizes = [8, 32], strides = [1, 1]} : vector<8x128xf32> to vector<8x32xf32>
    %149 = vector.extract_strided_slice %145 {offsets = [0, 96], sizes = [8, 32], strides = [1, 1]} : vector<8x128xf32> to vector<8x32xf32>
    %150 = arith.mulf %147, %108 : vector<8x32xf32>
    %151 = arith.mulf %146, %148 : vector<8x32xf32>
    %152 = arith.addf %150, %151 : vector<8x32xf32>
    %153 = math.tanh %152 : vector<8x32xf32>
    %154 = arith.mulf %149, %153 : vector<8x32xf32>
    %c3 = arith.constant 3 : index
    %c0_52 = arith.constant 0 : index
    %c0_53 = arith.constant 0 : index
    %155 = vector.load %arg2[%c3, %c0_52, %c0_53] : memref<4x8x32xf32, #tpu.memory_space<vmem>>, vector<1x8x32xf32>
    %156 = vector.shape_cast %155 : vector<1x8x32xf32> to vector<8x32xf32>
    %157 = tpu.concatenate %156, %132 in 1 : vector<8x32xf32>, vector<8x32xf32> -> vector<8x64xf32>
    %c0_54 = arith.constant 0 : index
    %c0_55 = arith.constant 0 : index
    %158 = vector.load %arg5[%c0_54, %c0_55] : memref<64x128xf32, #tpu.memory_space<vmem>>, vector<64x128xf32>
    %cst_56 = arith.constant dense<0.000000e+00> : vector<8x128xf32>
    %159 = tpu.matmul %157, %158, %cst_56 {dimension_numbers = #tpu.dot_dimension_numbers<[1], [0], [0], [1], [0, 0, 1, 1], [], []>} : vector<8x64xf32>, vector<64x128xf32>, vector<8x128xf32> -> vector<8x128xf32>
    %160 = arith.addf %159, %12 : vector<8x128xf32>
    %161 = math.tanh %160 : vector<8x128xf32>
    %162 = arith.negf %160 : vector<8x128xf32>
    %163 = math.exp %162 : vector<8x128xf32>
    %cst_57 = arith.constant 1.000000e+00 : f32
    %164 = vector.broadcast %cst_57 : f32 to vector<8x128xf32>
    %165 = arith.addf %164, %163 : vector<8x128xf32>
    %166 = arith.divf %164, %165 : vector<8x128xf32>
    %167 = arith.select %18, %161, %166 : vector<8x128xi1>, vector<8x128xf32>
    %168 = vector.extract_strided_slice %167 {offsets = [0, 0], sizes = [8, 32], strides = [1, 1]} : vector<8x128xf32> to vector<8x32xf32>
    %169 = vector.extract_strided_slice %167 {offsets = [0, 32], sizes = [8, 32], strides = [1, 1]} : vector<8x128xf32> to vector<8x32xf32>
    %170 = vector.extract_strided_slice %167 {offsets = [0, 64], sizes = [8, 32], strides = [1, 1]} : vector<8x128xf32> to vector<8x32xf32>
    %171 = vector.extract_strided_slice %167 {offsets = [0, 96], sizes = [8, 32], strides = [1, 1]} : vector<8x128xf32> to vector<8x32xf32>
    %172 = arith.mulf %169, %130 : vector<8x32xf32>
    %173 = arith.mulf %168, %170 : vector<8x32xf32>
    %174 = arith.addf %172, %173 : vector<8x32xf32>
    %175 = math.tanh %174 : vector<8x32xf32>
    %176 = arith.mulf %171, %175 : vector<8x32xf32>
    %177 = tpu.concatenate %176, %154 in 1 : vector<8x32xf32>, vector<8x32xf32> -> vector<8x64xf32>
    %c0_58 = arith.constant 0 : index
    %c0_59 = arith.constant 0 : index
    %178 = vector.load %arg8[%c0_58, %c0_59] : memref<64x128xf32, #tpu.memory_space<vmem>>, vector<64x128xf32>
    %cst_60 = arith.constant dense<0.000000e+00> : vector<8x128xf32>
    %179 = tpu.matmul %177, %178, %cst_60 {dimension_numbers = #tpu.dot_dimension_numbers<[1], [0], [0], [1], [0, 0, 1, 1], [], []>} : vector<8x64xf32>, vector<64x128xf32>, vector<8x128xf32> -> vector<8x128xf32>
    %c0_61 = arith.constant 0 : index
    %c0_62 = arith.constant 0 : index
    %180 = vector.load %arg9[%c0_61, %c0_62] : memref<1x128xf32, #tpu.memory_space<vmem>>, vector<1x128xf32>
    %181 = vector.broadcast %180 : vector<1x128xf32> to vector<8x128xf32>
    %182 = arith.addf %179, %181 : vector<8x128xf32>
    %183 = math.tanh %182 : vector<8x128xf32>
    %184 = arith.negf %182 : vector<8x128xf32>
    %185 = math.exp %184 : vector<8x128xf32>
    %cst_63 = arith.constant 1.000000e+00 : f32
    %186 = vector.broadcast %cst_63 : f32 to vector<8x128xf32>
    %187 = arith.addf %186, %185 : vector<8x128xf32>
    %188 = arith.divf %186, %187 : vector<8x128xf32>
    %189 = arith.select %18, %183, %188 : vector<8x128xi1>, vector<8x128xf32>
    %190 = vector.extract_strided_slice %189 {offsets = [0, 0], sizes = [8, 32], strides = [1, 1]} : vector<8x128xf32> to vector<8x32xf32>
    %191 = vector.extract_strided_slice %189 {offsets = [0, 32], sizes = [8, 32], strides = [1, 1]} : vector<8x128xf32> to vector<8x32xf32>
    %192 = vector.extract_strided_slice %189 {offsets = [0, 64], sizes = [8, 32], strides = [1, 1]} : vector<8x128xf32> to vector<8x32xf32>
    %193 = vector.extract_strided_slice %189 {offsets = [0, 96], sizes = [8, 32], strides = [1, 1]} : vector<8x128xf32> to vector<8x32xf32>
    %194 = arith.mulf %191, %152 : vector<8x32xf32>
    %195 = arith.mulf %190, %192 : vector<8x32xf32>
    %196 = arith.addf %194, %195 : vector<8x32xf32>
    %197 = math.tanh %196 : vector<8x32xf32>
    %198 = arith.mulf %193, %197 : vector<8x32xf32>
    %199 = vector.shape_cast %66 : vector<8x32xf32> to vector<1x8x32xf32>
    %200 = vector.shape_cast %110 : vector<8x32xf32> to vector<1x8x32xf32>
    %201 = vector.shape_cast %154 : vector<8x32xf32> to vector<1x8x32xf32>
    %202 = vector.shape_cast %198 : vector<8x32xf32> to vector<1x8x32xf32>
    %203 = tpu.concatenate %199, %200, %201, %202 in 0 : vector<1x8x32xf32>, vector<1x8x32xf32>, vector<1x8x32xf32>, vector<1x8x32xf32> -> vector<4x8x32xf32>
    %c0_64 = arith.constant 0 : index
    %c0_65 = arith.constant 0 : index
    %c0_66 = arith.constant 0 : index
    %204 = vector.load %arg10[%c0_64, %c0_65, %c0_66] : memref<4x8x32xf32, #tpu.memory_space<vmem>>, vector<4x8x32xf32>
    tpu.vector_store %arg10[%c0_64, %c0_65, %c0_66], %203 {strides = array<i32>} : memref<4x8x32xf32, #tpu.memory_space<vmem>>, vector<4x8x32xf32>,
    return
  }
  func.func @transform_0(%arg0: i32) -> (i32, i32) {
    %c0_i32 = arith.constant 0 : i32
    %c0_i32_0 = arith.constant 0 : i32
    %c0_i32_1 = arith.constant 0 : i32
    return %c0_i32, %c0_i32_0 : i32, i32
  }
  func.func @transform_1(%arg0: i32) -> (i32, i32, i32) {
    %c0_i32 = arith.constant 0 : i32
    %c0_i32_0 = arith.constant 0 : i32
    %c0_i32_1 = arith.constant 0 : i32
    %c0_i32_2 = arith.constant 0 : i32
    return %c0_i32, %c0_i32_0, %c0_i32_1 : i32, i32, i32
  }
  func.func @transform_2(%arg0: i32) -> (i32, i32) {
    %c0_i32 = arith.constant 0 : i32
    %c0_i32_0 = arith.constant 0 : i32
    %c0_i32_1 = arith.constant 0 : i32
    return %c0_i32, %c0_i32_0 : i32, i32
  }
  func.func @transform_3(%arg0: i32) -> (i32, i32) {
    %c0_i32 = arith.constant 0 : i32
    %c0_i32_0 = arith.constant 0 : i32
    %c0_i32_1 = arith.constant 0 : i32
    return %c0_i32, %c0_i32_0 : i32, i32
  }
  func.func @transform_4(%arg0: i32) -> (i32, i32) {
    %c0_i32 = arith.constant 0 : i32
    %c0_i32_0 = arith.constant 0 : i32
    %c0_i32_1 = arith.constant 0 : i32
    return %c0_i32, %c0_i32_0 : i32, i32
  }
  func.func @transform_5(%arg0: i32) -> (i32, i32) {
    %c0_i32 = arith.constant 0 : i32
    %c0_i32_0 = arith.constant 0 : i32
    %c0_i32_1 = arith.constant 0 : i32
    return %c0_i32, %c0_i32_0 : i32, i32
  }
  func.func @transform_6(%arg0: i32) -> (i32, i32) {
    %c0_i32 = arith.constant 0 : i32
    %c0_i32_0 = arith.constant 0 : i32
    %c0_i32_1 = arith.constant 0 : i32
    return %c0_i32, %c0_i32_0 : i32, i32
  }
  func.func @transform_7(%arg0: i32) -> (i32, i32) {
    %c0_i32 = arith.constant 0 : i32
    %c0_i32_0 = arith.constant 0 : i32
    %c0_i32_1 = arith.constant 0 : i32
    return %c0_i32, %c0_i32_0 : i32, i32
  }
  func.func @transform_8(%arg0: i32) -> (i32, i32) {
    %c0_i32 = arith.constant 0 : i32
    %c0_i32_0 = arith.constant 0 : i32
    %c0_i32_1 = arith.constant 0 : i32
    return %c0_i32, %c0_i32_0 : i32, i32
  }
  func.func @transform_9(%arg0: i32) -> (i32, i32, i32) {
    %c0_i32 = arith.constant 0 : i32
    %c0_i32_0 = arith.constant 0 : i32
    %c0_i32_1 = arith.constant 0 : i32
    %c0_i32_2 = arith.constant 0 : i32
    return %c0_i32, %c0_i32_0, %c0_i32_1 : i32, i32, i32
  }
}

</mosaic_0001>

<bundles_post_ra>
// kernel: tpu_custom_call.1
= control target key start
LH: loop header
LB: loop body
LE: loop exit
PB: predicated region body
PF: predicated region fallthrough
CT: control target
= control target key end

     0   :  { %14 = vsyncpa [#allocation3], 0  ;;  %s2200_s0 = inlined_call_operand.hbm [shape: f32[8,16], index: 0, kind: input, shape index: {}]   ;;  %s2201_s1 = inlined_call_operand.hbm [shape: f32[4,8,32], index: 1, kind: input, shape index: {}]   ;;  %s2202_s2 = inlined_call_operand.hbm [shape: f32[16,32], index: 2, kind: input, shape index: {}]   ;;  %s2203_s3 = inlined_call_operand.vmem [shape: f32[1,32], index: 3, kind: input, shape index: {}]   ;;  %s2204_s4 = inlined_call_operand.hbm [shape: f32[64,128], index: 4, kind: input, shape index: {}]   ;;  %s2205_s5 = inlined_call_operand.hbm [shape: f32[32,128], index: 5, kind: input, shape index: {}]   ;;  %s2206_s6 = inlined_call_operand.vmem [shape: f32[1,128], index: 6, kind: input, shape index: {}]   ;;  %s2207_s7 = inlined_call_operand.hbm [shape: f32[64,128], index: 7, kind: input, shape index: {}]   ;;  %s2208_s8 = inlined_call_operand.vmem [shape: f32[1,128], index: 8, kind: input, shape index: {}]   ;;  %s2209_s9 = inlined_call_operand.hbm [shape: f32[4,8,32], index: 9, kind: output, shape index: {}]  }
   0x1   :  { %15 = vsyncpa [#allocation6], 0 }
   0x2   :  { %16 = vsyncpa [#allocation9], 0 }
   0x3   :  { %17 = vsyncpa [#allocation12], 0 }
   0x4   :  { %18 = vsyncpa [#allocation4], 0  ;;  %s1803_s30 = smov [#allocation5]   ;;  %s1639_s13 = scalar_lea.hbm %s2201_s1, 512 }
   0x5   :  { %s34_s10 = sshll.u32 %s1803_s30, 4  ;;  %p1640_p0 = scmp.ne.s32.totalorder %s2201_s1, %s1639_s13  ;;  %s35_s10 = int_to_ptr.vmem [resolvable:$true] %s34_s10 }
   0x6   :  { %p1643_p1 = scmp.lt.u32.totalorder %s1639_s13, %s2201_s1 }
   0x8   :  { %p1645_p2 = pnand %p1643_p1, %p1640_p0 }
   0xa   :  { %1648 = shalt.err (!%p1645_p2)
}
   0xb   :  { %s1649_s18 = scalar_lea.vmem %s35_s10, 512  ;;  %p1654_p4 = scmp.lt.s32.totalorder %s35_s10, %s35_s10 }
   0xc   :  { %p1650_p3 = scmp.ne.s32.totalorder %s35_s10, %s1649_s18  ;;  %p1655_p5 = scmp.lt.s32.totalorder %s1649_s18, %s1649_s18 }
   0xe   :  { %p1656_p6 = por %p1655_p5, %p1654_p4 }
  0x10   :  { %p1657_p7 = pnand %p1656_p6, %p1650_p3 }
  0x12   :  { %1660 = shalt.err (!%p1657_p7)
}
  0x13   :  { %s1804_s19 = smov 128   ;;  %s1805_s20 = smov 8  }
  0x14   :  { %40 = dma.hbm_to_vmem [thread:$0]  %s2201_s1, 512, %s35_s10, [#allocation6], %s1804_s19, %s1804_s19, %s1805_s20  }
  0x15   :  { %s1806_s23 = smov [#allocation8]   ;;  %s1807_s25 = smov [#allocation2]  }
  0x16   :  { %s60_s24 = sshll.u32 %s1806_s23, 4  ;;  %s25_s26 = sshll.u32 %s1807_s25, 4  ;;  %s61_s24 = int_to_ptr.vmem [resolvable:$true] %s60_s24  ;;  %s26_s26 = int_to_ptr.vmem [resolvable:$true] %s25_s26 }
  0x17   :  { %s1661_s29 = scalar_lea.hbm %s2204_s4, 1024 }
  0x18   :  { %p1662_p8 = scmp.ne.s32.totalorder %s2204_s4, %s1661_s29  ;;  %p1665_p9 = scmp.lt.u32.totalorder %s1661_s29, %s2204_s4 }
  0x1a   :  { %p1667_p10 = pnand %p1665_p9, %p1662_p8 }
  0x1c   :  { %1670 = shalt.err (!%p1667_p10)
}
  0x1d   :  { %s1671_s1 = scalar_lea.vmem %s61_s24, 1024  ;;  %p1676_p12 = scmp.lt.s32.totalorder %s61_s24, %s61_s24 }
  0x1e   :  { %p1672_p11 = scmp.ne.s32.totalorder %s61_s24, %s1671_s1  ;;  %p1677_p13 = scmp.lt.s32.totalorder %s1671_s1, %s1671_s1 }
  0x20   :  { %p1678_p0 = por %p1677_p13, %p1676_p12 }
  0x22   :  { %p1679_p1 = pnand %p1678_p0, %p1672_p11 }
  0x24   :  { %1682 = shalt.err (!%p1679_p1)
}
  0x25   :  { %66 = dma.hbm_to_vmem [thread:$0]  %s2204_s4, 1024, %s61_s24, [#allocation9], %s1804_s19, %s1804_s19, %s1805_s20  }
  0x26   :  { %s1683_s17 = scalar_lea.hbm %s2200_s0, 128 }
  0x27   :  { %p1684_p2 = scmp.ne.s32.totalorder %s2200_s0, %s1683_s17  ;;  %p1687_p3 = scmp.lt.u32.totalorder %s1683_s17, %s2200_s0 }
  0x29   :  { %p1689_p4 = pnand %p1687_p3, %p1684_p2 }
  0x2b   :  { %1692 = shalt.err (!%p1689_p4)
}
  0x2c   :  { %s1693_s25 = scalar_lea.vmem %s26_s26, 128  ;;  %p1698_p6 = scmp.lt.s32.totalorder %s26_s26, %s26_s26 }
  0x2d   :  { %p1694_p5 = scmp.ne.s32.totalorder %s26_s26, %s1693_s25  ;;  %p1699_p7 = scmp.lt.s32.totalorder %s1693_s25, %s1693_s25 }
  0x2f   :  { %p1700_p8 = por %p1699_p7, %p1698_p6 }
  0x31   :  { %p1701_p9 = pnand %p1700_p8, %p1694_p5 }
  0x33   :  { %1704 = shalt.err (!%p1701_p9)
}
  0x34   :  { %28 = dma.hbm_to_vmem [thread:$0]  %s2200_s0, 128, %s26_s26, [#allocation3]  }
  0x35   :  { %s1808_s27 = smov [#allocation7]   ;;  %s1809_s29 = smov [#allocation10]  }
  0x36   :  { %s46_s28 = sshll.u32 %s1808_s27, 4  ;;  %s72_s30 = sshll.u32 %s1809_s29, 4  ;;  %s47_s28 = int_to_ptr.vmem [resolvable:$true] %s46_s28  ;;  %s73_s30 = int_to_ptr.vmem [resolvable:$true] %s72_s30 }
  0x37   :  { %s1705_s13 = scalar_lea.hbm %s2202_s2, 256 }
  0x38   :  { %p1706_p10 = scmp.ne.s32.totalorder %s2202_s2, %s1705_s13  ;;  %p1709_p11 = scmp.lt.u32.totalorder %s1705_s13, %s2202_s2 }
  0x3a   :  { %p1711_p12 = pnand %p1709_p11, %p1706_p10 }
  0x3c   :  { %1714 = shalt.err (!%p1711_p12)
}
  0x3d   :  { %s1715_s0 = scalar_lea.vmem %s47_s28, 256  ;;  %p1720_p0 = scmp.lt.s32.totalorder %s47_s28, %s47_s28 }
  0x3e   :  { %p1716_p13 = scmp.ne.s32.totalorder %s47_s28, %s1715_s0  ;;  %p1721_p1 = scmp.lt.s32.totalorder %s1715_s0, %s1715_s0 }
  0x40   :  { %p1722_p2 = por %p1721_p1, %p1720_p0 }
  0x42   :  { %p1723_p3 = pnand %p1722_p2, %p1716_p13 }
  0x44   :  { %1726 = shalt.err (!%p1723_p3)
}
  0x45   :  { %52 = dma.hbm_to_vmem [thread:$0]  %s2202_s2, 256, %s47_s28, [#allocation6], %s1804_s19, %s1804_s19, %s1805_s20  }
  0x46   :  { %s1727_s21 = scalar_lea.hbm %s2205_s5, 512 }
  0x47   :  { %p1728_p4 = scmp.ne.s32.totalorder %s2205_s5, %s1727_s21  ;;  %p1731_p5 = scmp.lt.u32.totalorder %s1727_s21, %s2205_s5 }
  0x49   :  { %p1733_p6 = pnand %p1731_p5, %p1728_p4 }
  0x4b   :  { %1736 = shalt.err (!%p1733_p6)
}
  0x4c   :  { %s1737_s24 = scalar_lea.vmem %s73_s30, 512  ;;  %p1742_p8 = scmp.lt.s32.totalorder %s73_s30, %s73_s30 }
  0x4d   :  { %p1738_p7 = scmp.ne.s32.totalorder %s73_s30, %s1737_s24  ;;  %p1743_p9 = scmp.lt.s32.totalorder %s1737_s24, %s1737_s24 }
  0x4f   :  { %p1744_p10 = por %p1743_p9, %p1742_p8 }
  0x51   :  { %p1745_p11 = pnand %p1744_p10, %p1738_p7 }
  0x53   :  { %1748 = shalt.err (!%p1745_p11)
}
  0x54   :  { %78 = dma.hbm_to_vmem [thread:$0]  %s2205_s5, 512, %s73_s30, [#allocation9], %s1804_s19, %s1804_s19, %s1805_s20  }
  0x55   :  { %s1810_s28 = smov [#allocation11]   ;;  %s1749_s13 = scalar_lea.hbm %s2207_s7, 1024 }
  0x56   :  { %s86_s29 = sshll.u32 %s1810_s28, 4  ;;  %p1750_p12 = scmp.ne.s32.totalorder %s2207_s7, %s1749_s13  ;;  %s87_s29 = int_to_ptr.vmem [resolvable:$true] %s86_s29 }
  0x57   :  { %p1753_p13 = scmp.lt.u32.totalorder %s1749_s13, %s2207_s7 }
  0x59   :  { %p1755_p0 = pnand %p1753_p13, %p1750_p12 }
  0x5b   :  { %1758 = shalt.err (!%p1755_p0)
}
  0x5c   :  { %s1759_s0 = scalar_lea.vmem %s87_s29, 1024  ;;  %p1764_p2 = scmp.lt.s32.totalorder %s87_s29, %s87_s29 }
  0x5d   :  { %p1760_p1 = scmp.ne.s32.totalorder %s87_s29, %s1759_s0  ;;  %p1765_p3 = scmp.lt.s32.totalorder %s1759_s0, %s1759_s0 }
  0x5f   :  { %p1766_p4 = por %p1765_p3, %p1764_p2 }
  0x61   :  { %p1767_p5 = pnand %p1766_p4, %p1760_p1 }
  0x63   :  { %1770 = shalt.err (!%p1767_p5)
}
  0x64   :  { %92 = dma.hbm_to_vmem [thread:$0]  %s2207_s7, 1024, %s87_s29, [#allocation12], %s1804_s19, %s1804_s19, %s1805_s20  }
  0x65   :  { %1793 = dma.done.wait [#allocation3], 128  }
  0x66   :  { %1794 = vsyncadd [#allocation3], 4294967168 }
  0x67   :  { %1795 = dma.done.wait [#allocation6], 768  }
  0x68   :  { %1796 = vsyncadd [#allocation6], 4294966528 }
  0x69   :  { %1797 = dma.done.wait [#allocation9], 1536  }
  0x6a   :  { %1798 = vsyncadd [#allocation9], 4294965760 }
  0x6b   :  { %1799 = dma.done.wait [#allocation12], 1024  }
  0x6c   :  { %1800 = vsyncadd [#allocation12], 4294966272  ;;  %v1811_v0 = vmov 0.0|0.0   ;;  %vm1812_vm0 = vmmov 0   ;;  %v1813_v1 = vmov 0.0   ;;  %v114_v2 = vld [vmem:[#allocation7] sm:$0xff]  ;;  %v283_v40 = vlaneseq }
  0x6d   :  { %1456 = vmatprep.subr.bf16.mxu0 %v1811_v0  ;;  %1290 = vmatprep.mubr.msk.f32.mxu0 %vm1812_vm0, %v1813_v1  ;;  %v115_v3 = vld [vmem:[#allocation7 + $0x8] sm:$0xff]  ;;  %v290_v5 = vld [vmem:[#allocation8] sm:$0xff]  ;;  %v291_v6 = vld [vmem:[#allocation8 + $0x8] sm:$0xff]  ;;  %vm123_vm1 = vcmask 130048   ;;  %vm209_vm2 = vcmask 261120   ;;  %vm298_vm3 = vcmask 523264  }
  0x6e   :  { %1459 = vmatprep.subr.bf16.mxu1 %v1811_v0  ;;  %1301 = vmatprep.mubr.msk.f32.mxu1 %vm1812_vm0, %v1813_v1  ;;  %v1457_v4 = vpack.c.bf16 %v115_v3, %v114_v2  ;;  %v198_v7 = vld [vmem:[#allocation10] sm:$0xff]  ;;  %v199_v8 = vld [vmem:[#allocation10 + $0x8] sm:$0xff]  ;;  %v1960_v10 = vpack.c.bf16 %v291_v6, %v290_v5  ;;  %v292_v12 = vld [vmem:[#allocation8 + $0x10] sm:$0xff]  ;;  %v284_v42 = vand.u32 127, %v283_v40 }
  0x6f   :  { %v113_v9 = vld [vmem:[#allocation2] sm:$0xff]  ;;  %v1460_v11 = vpack.c.bf16 %v199_v8, %v198_v7  ;;  %v293_v13 = vld [vmem:[#allocation8 + $0x18] sm:$0xff]  ;;  %v294_v15 = vld [vmem:[#allocation8 + $0x20] sm:$0xff] }
  0x70   :  { %1458 = vmatpush3.bf16.msra.mxu0 %v1457_v4  ;;  %v1965_v14 = vpack.c.bf16 %v293_v13, %v292_v12  ;;  %v295_v16 = vld [vmem:[#allocation8 + $0x28] sm:$0xff]  ;;  %v200_v18 = vld [vmem:[#allocation10 + $0x10] sm:$0xff]  ;;  %v201_v19 = vld [vmem:[#allocation10 + $0x18] sm:$0xff]  ;;  %vm285_vm4 = vcmp.ge.s32.totalorder %v284_v42, 64  ;;  %vm286_vm5 = vcmp.lt.s32.totalorder %v284_v42, 96 }
  0x71   :  { %1465 = vmatprep.subr.bf16.mxu0 %v1811_v0  ;;  %1461 = vmatpush3.bf16.msra.mxu1 %v1460_v11  ;;  %v1971_v17 = vpack.c.bf16 %v295_v16, %v294_v15  ;;  %v1463_v20 = vpack.c.bf16 %v201_v19, %v200_v18  ;;  %v296_v21 = vld [vmem:[#allocation8 + $0x30] sm:$0xff]  ;;  %v297_v22 = vld [vmem:[#allocation8 + $0x38] sm:$0xff]  ;;  %v1185_v26 = vld [vmem:[%s2203_s3] ss:$0 sm:$0xff]  ;;  %s1814_s3 = smov 64  }
  0x72   :  { %1462 = vmatprep.subr.bf16.mxu1 %v1811_v0  ;;  %v1976_v23 = vpack.c.bf16 %v297_v22, %v296_v21  ;;  %v288_v24 = vld [vmem:[#allocation5] sm:$0xff]  ;;  %v1187_v33 = vld [vmem:[%s2206_s6] ss:$0 sm:$0xff]  ;;  %vm2005_vm6 = vmand %vm285_vm4, %vm286_vm5  ;;  %s1815_s6 = smov 32  }
  0x73   :  { %1291 = vmatmul.mubr.msk.f32.vlgmr.msra.gmra.mrb[0].mxu0 %vm123_vm1, %v113_v9  ;;  %v289_v25 = vsel %vm209_vm2, %v288_v24, 0.0  ;;  %v402_v52 = vld [vmem:[#allocation11] sm:$0xff]  ;;  %v403_v53 = vld [vmem:[#allocation11 + $0x8] sm:$0xff]  ;;  %v404_v54 = vld [vmem:[#allocation11 + $0x10] sm:$0xff] }
  0x74   :  { %1467 = vmatpush3.bf16.msra.mxu0 %v1960_v10  ;;  %1320 = vmatprep.mubr.msk.f32.mxu0 %vm1812_vm0, %v1813_v1  ;;  %v2016_v55 = vpack.c.bf16 %v403_v53, %v402_v52  ;;  %v405_v56 = vld [vmem:[#allocation11 + $0x18] sm:$0xff]  ;;  %v406_v58 = vld [vmem:[#allocation11 + $0x20] sm:$0xff]  ;;  %v407_v59 = vld [vmem:[#allocation11 + $0x28] sm:$0xff] }
  0x75   :  { %1468 = vmatprep.subr.bf16.mxu0 %v1811_v0  ;;  %1464 = vmatpush3.bf16.msra.mxu1 %v1463_v20  ;;  %v2019_v57 = vpack.c.bf16 %v405_v56, %v404_v54  ;;  %v2023_v60 = vpack.c.bf16 %v407_v59, %v406_v58  ;;  %v408_v61 = vld [vmem:[#allocation11 + $0x30] sm:$0xff]  ;;  %v409_v62 = vld [vmem:[#allocation11 + $0x38] sm:$0xff]  ;;  %v2062_v11 = vld [vmem:[%s2208_s8] ss:$0 sm:$0xff]  ;;  %s1816_s8 = smov [#allocation13]  }
  0x76   :  { %1477 = vmatprep.subr.bf16.mxu1 %v1811_v0  ;;  %v2028_v2 = vpack.c.bf16 %v409_v62, %v408_v61  ;;  %v516_v5 = vld [vmem:[#allocation5 + $0x8] sm:$0xff]  ;;  %v727_v54 = vld [vmem:[#allocation5 + $0x10] sm:$0xff]  ;;  %s1170_s22 = sshll.u32 %s1816_s8, 4  ;;  %s1171_s22 = int_to_ptr.vmem [resolvable:$true] %s1170_s22 }
  0x77   :  { %s1771_s23 = scalar_lea.vmem %s1171_s22, 512  ;;  %p1776_p7 = scmp.lt.s32.totalorder %s1171_s22, %s1171_s22 }
  0x78   :  { %1470 = vmatpush3.bf16.msra.mxu0 %v1965_v14  ;;  %p1772_p6 = scmp.ne.s32.totalorder %s1171_s22, %s1771_s23  ;;  %p1777_p8 = scmp.lt.s32.totalorder %s1771_s23, %s1771_s23 }
  0x79   :  { %1471 = vmatprep.subr.bf16.mxu0 %v1811_v0 }
  0x7a   :  { %p1778_p9 = por %p1777_p8, %p1776_p7 }
  0x7c   :  { %1473 = vmatpush3.bf16.msra.mxu0 %v1971_v17  ;;  %p1779_p10 = pnand %p1778_p9, %p1772_p6 }
  0x7d   :  { %1474 = vmatprep.subr.bf16.mxu0 %v1811_v0 }
  0x80   :  { %1476 = vmatpush3.bf16.msra.mxu0 %v1976_v23 }
  0x81   :  { %1489 = vmatprep.subr.bf16.mxu0 %v1811_v0 }
  0x83   :  { %1321 = vmatmul.mubr.msk.f32.vlgmr.msra.gmra.mrb[2].mxu0 %vm298_vm3, %v289_v25 }
  0x84   :  { %1491 = vmatpush3.bf16.msra.mxu0 %v1960_v10  ;;  %1358 = vmatprep.mubr.msk.f32.mxu0 %vm1812_vm0, %v1813_v1 }
  0x85   :  { %1492 = vmatprep.subr.bf16.mxu0 %v1811_v0 }
  0x88   :  { %1494 = vmatpush3.bf16.msra.mxu0 %v1965_v14 }
  0x89   :  { %1495 = vmatprep.subr.bf16.mxu0 %v1811_v0 }
  0x8c   :  { %1497 = vmatpush3.bf16.msra.mxu0 %v1971_v17 }
  0x8d   :  { %1498 = vmatprep.subr.bf16.mxu0 %v1811_v0 }
  0x90   :  { %1500 = vmatpush3.bf16.msra.mxu0 %v1976_v23 }
  0x91   :  { %1513 = vmatprep.subr.bf16.mxu0 %v1811_v0 }
 0x146   :  { %v193_v27 = vpop.f32.mrb[0].mxu0 }
 0x147   :  { %v194_v28 = vadd.f32 %v1185_v26, %v193_v27  ;;  %v1292_v29 = vpop.f32.mrb[1].mxu0 }
 0x149   :  { %v197_v30 = vmax.f32 %v194_v28, 0.0 }
 0x14b   :  { %1302 = vmatmul.mubr.msk.f32.vlgmr.msra.gmra.mrb[0].mxu1 %vm209_vm2, %v197_v30 }
 0x14c   :  { %1339 = vmatprep.mubr.msk.f32.mxu1 %vm1812_vm0, %v1813_v1  ;;  %1479 = vmatpush3.bf16.msra.mxu1 %v2016_v55 }
 0x14d   :  { %1480 = vmatprep.subr.bf16.mxu1 %v1811_v0 }
 0x150   :  { %1482 = vmatpush3.bf16.msra.mxu1 %v2019_v57 }
 0x151   :  { %1483 = vmatprep.subr.bf16.mxu1 %v1811_v0 }
 0x154   :  { %1485 = vmatpush3.bf16.msra.mxu1 %v2023_v60 }
 0x155   :  { %1486 = vmatprep.subr.bf16.mxu1 %v1811_v0 }
 0x156   :  { %v368_v31 = vpop.f32.mrb[2].mxu0 }
 0x157   :  { %v1322_v32 = vpop.f32.mrb[3].mxu0 }
 0x158   :  { %1488 = vmatpush3.bf16.msra.mxu1 %v2028_v2 }
 0x159   :  { %1501 = vmatprep.subr.bf16.mxu1 %v1811_v0 }
 0x21e   :  { %v279_v34 = vpop.f32.mrb[0].mxu1 }
 0x21f   :  { %v2002_v35 = vadd.f32 %v1187_v33, %v279_v34  ;;  %v1303_v36 = vpop.f32.mrb[1].mxu1 }
 0x221   :  { %v369_v37 = vadd.f32 %v368_v31, %v2002_v35 }
 0x223   :  { %v1190_v38 = vmul.f32 -1.442695, %v369_v37 }
 0x225   :  { %1575 = vpow2.f32 %v1190_v38 }
 0x226   :  { %1577 = vtanh.f32 %v369_v37 }
 0x22f   :  { %v1576_v39 = vpop.eup %1575 }
 0x230   :  { %v376_v41 = vadd.f32 1.0, %v1576_v39  ;;  %v1578_v44 = vpop.eup %1577 }
 0x232   :  { %1579 = vrcp.f32 %v376_v41 }
 0x23c   :  { %v1580_v45 = vpop.eup %1579 }
 0x23d   :  { %v379_v46 = vsel %vm2005_vm6, %v1578_v44, %v1580_v45 }
 0x23e   :  { %382 = vrot.lane.b32.xlu0 %v379_v46, %s1814_s3  ;;  %v380_v49 = vmul.f32 0.0, %v379_v46 }
 0x2b0   :  { %v383_v47 = vpop.permute.xlu0 %382 }
 0x2b1   :  { %v385_v48 = vmul.f32 %v383_v47, %v379_v46 }
 0x2b3   :  { %387 = vrot.lane.b32.xlu0 %v385_v48, %s1815_s6 }
 0x325   :  { %v388_v50 = vpop.permute.xlu0 %387 }
 0x326   :  { %v2013_v51 = vadd.f32 %v388_v50, %v380_v49 }
 0x328   :  { %1581 = vtanh.f32 %v2013_v51 }
 0x332   :  { %v1582_v63 = vpop.eup %1581 }
 0x333   :  { %393 = vrot.lane.b32.xlu1 %v1582_v63, %s1814_s3 }
 0x3a5   :  { %v394_v3 = vpop.permute.xlu1 %393 }
 0x3a6   :  { %v396_v4 = vmul.f32 %v394_v3, %v379_v46 }
 0x3a8   :  { %517 = vrot.lane.b32.xlu0 %v396_v4, %s1814_s3  ;;  %398 = vrot.lane.b32.xlu1 %v396_v4, %s1815_s6 }
 0x41a   :  { %v518_v6 = vpop.permute.xlu0 %517  ;;  %v399_v7 = vpop.permute.xlu1 %398 }
 0x41b   :  { %v520_v8 = vsel %vm209_vm2, %v516_v5, %v518_v6  ;;  %v401_v9 = vsel %vm209_vm2, %v399_v7, 0.0 }
 0x41c   :  { %1340 = vmatmul.mubr.msk.f32.vlgmr.msra.gmra.mrb[2].mxu1 %vm298_vm3, %v401_v9  ;;  %1359 = vmatmul.mubr.msk.f32.vlgmr.msra.gmra.mrb[4].mxu0 %vm298_vm3, %v520_v8 }
 0x41d   :  { %1503 = vmatpush3.bf16.msra.mxu1 %v2016_v55  ;;  %1515 = vmatpush3.bf16.msra.mxu0 %v1960_v10 }
 0x41e   :  { %1504 = vmatprep.subr.bf16.mxu1 %v1811_v0  ;;  %1516 = vmatprep.subr.bf16.mxu0 %v1811_v0 }
 0x41f   :  { %1377 = vmatprep.mubr.msk.f32.mxu1 %vm1812_vm0, %v1813_v1  ;;  %1396 = vmatprep.mubr.msk.f32.mxu0 %vm1812_vm0, %v1813_v1 }
 0x421   :  { %1506 = vmatpush3.bf16.msra.mxu1 %v2019_v57  ;;  %1518 = vmatpush3.bf16.msra.mxu0 %v1965_v14 }
 0x422   :  { %1507 = vmatprep.subr.bf16.mxu1 %v1811_v0  ;;  %1519 = vmatprep.subr.bf16.mxu0 %v1811_v0 }
 0x425   :  { %1509 = vmatpush3.bf16.msra.mxu1 %v2023_v60  ;;  %1521 = vmatpush3.bf16.msra.mxu0 %v1971_v17 }
 0x426   :  { %1510 = vmatprep.subr.bf16.mxu1 %v1811_v0  ;;  %1522 = vmatprep.subr.bf16.mxu0 %v1811_v0 }
 0x429   :  { %1512 = vmatpush3.bf16.msra.mxu1 %v2028_v2  ;;  %1524 = vmatpush3.bf16.msra.mxu0 %v1976_v23 }
 0x42a   :  { %1525 = vmatprep.subr.bf16.mxu1 %v1811_v0  ;;  %1537 = vmatprep.subr.bf16.mxu0 %v1811_v0 }
 0x4ef   :  { %v486_v12 = vpop.f32.mrb[2].mxu1  ;;  %v590_v13 = vpop.f32.mrb[4].mxu0 }
 0x4f0   :  { %v487_v15 = vadd.f32 %v2062_v11, %v486_v12  ;;  %v591_v16 = vadd.f32 %v590_v13, %v2002_v35  ;;  %v1341_v18 = vpop.f32.mrb[3].mxu1  ;;  %v1360_v19 = vpop.f32.mrb[5].mxu0 }
 0x4f2   :  { %v1193_v20 = vmul.f32 -1.442695, %v487_v15  ;;  %v1195_v21 = vmul.f32 -1.442695, %v591_v16 }
 0x4f4   :  { %1583 = vpow2.f32 %v1193_v20 }
 0x4f5   :  { %1585 = vpow2.f32 %v1195_v21 }
 0x4f6   :  { %1587 = vtanh.f32 %v487_v15 }
 0x4f7   :  { %1589 = vtanh.f32 %v591_v16 }
 0x4fe   :  { %v1584_v22 = vpop.eup %1583 }
 0x4ff   :  { %v1586_v24 = vpop.eup %1585  ;;  %v494_v25 = vadd.f32 1.0, %v1584_v22 }
 0x500   :  { %v598_v26 = vadd.f32 1.0, %v1586_v24  ;;  %v1588_v27 = vpop.eup %1587 }
 0x501   :  { %1591 = vrcp.f32 %v494_v25  ;;  %v1590_v28 = vpop.eup %1589 }
 0x502   :  { %1593 = vrcp.f32 %v598_v26 }
 0x50b   :  { %v1592_v29 = vpop.eup %1591 }
 0x50c   :  { %v1594_v30 = vpop.eup %1593  ;;  %v497_v31 = vsel %vm2005_vm6, %v1588_v27, %v1592_v29 }
 0x50d   :  { %500 = vrot.lane.b32.xlu1 %v497_v31, %s1814_s3  ;;  %v601_v32 = vsel %vm2005_vm6, %v1590_v28, %v1594_v30  ;;  %v498_v38 = vmul.f32 0.0, %v497_v31 }
 0x50e   :  { %604 = vrot.lane.b32.xlu0 %v601_v32, %s1814_s3  ;;  %v602_v40 = vmul.f32 %v601_v32, %v2013_v51 }
 0x57f   :  { %v501_v33 = vpop.permute.xlu1 %500 }
 0x580   :  { %v503_v34 = vmul.f32 %v501_v33, %v497_v31  ;;  %v605_v36 = vpop.permute.xlu0 %604 }
 0x581   :  { %v607_v37 = vmul.f32 %v605_v36, %v601_v32 }
 0x582   :  { %505 = vrot.lane.b32.xlu1 %v503_v34, %s1815_s6 }
 0x583   :  { %609 = vrot.lane.b32.xlu0 %v607_v37, %s1815_s6 }
 0x5f4   :  { %v506_v39 = vpop.permute.xlu1 %505 }
 0x5f5   :  { %v2075_v41 = vadd.f32 %v506_v39, %v498_v38  ;;  %v610_v42 = vpop.permute.xlu0 %609  ;;  %v938_v38 = vld [vmem:[#allocation5 + $0x18] sm:$0xff] }
 0x5f6   :  { %v2077_v44 = vadd.f32 %v610_v42, %v602_v40 }
 0x5f7   :  { %1595 = vtanh.f32 %v2075_v41 }
 0x5f8   :  { %1597 = vtanh.f32 %v2077_v44 }
 0x601   :  { %v1596_v45 = vpop.eup %1595 }
 0x602   :  { %v1598_v46 = vpop.eup %1597  ;;  %511 = vrot.lane.b32.xlu1 %v1596_v45, %s1814_s3 }
 0x603   :  { %615 = vrot.lane.b32.xlu0 %v1598_v46, %s1814_s3 }
 0x674   :  { %v512_v47 = vpop.permute.xlu1 %511 }
 0x675   :  { %v2083_v48 = vmul.f32 %v512_v47, %v497_v31  ;;  %v616_v49 = vpop.permute.xlu0 %615 }
 0x676   :  { %v618_v50 = vmul.f32 %v616_v49, %v601_v32 }
 0x677   :  { %624 = vrot.lane.b32.xlu0 %v2083_v48, %s1814_s3 }
 0x678   :  { %620 = vrot.lane.b32.xlu1 %v618_v50, %s1815_s6 }
 0x67c   :  { %728 = vrot.lane.b32.xlu1 %v618_v50, %s1814_s3 }
 0x6e9   :  { %v625_v51 = vpop.permute.xlu0 %624 }
 0x6ea   :  { %v621_v52 = vpop.permute.xlu1 %620 }
 0x6eb   :  { %v627_v53 = vsel %vm209_vm2, %v621_v52, %v625_v51 }
 0x6ec   :  { %1378 = vmatmul.mubr.msk.f32.vlgmr.msra.gmra.mrb[4].mxu1 %vm298_vm3, %v627_v53 }
 0x6ed   :  { %1527 = vmatpush3.bf16.msra.mxu1 %v2016_v55  ;;  %1415 = vmatprep.mubr.msk.f32.mxu1 %vm1812_vm0, %v1813_v1 }
 0x6ee   :  { %v729_v56 = vpop.permute.xlu1 %728  ;;  %1528 = vmatprep.subr.bf16.mxu1 %v1811_v0 }
 0x6ef   :  { %v731_v58 = vsel %vm209_vm2, %v727_v54, %v729_v56 }
 0x6f0   :  { %1397 = vmatmul.mubr.msk.f32.vlgmr.msra.gmra.mrb[6].mxu0 %vm298_vm3, %v731_v58 }
 0x6f1   :  { %1530 = vmatpush3.bf16.msra.mxu1 %v2019_v57  ;;  %1539 = vmatpush3.bf16.msra.mxu0 %v1960_v10 }
 0x6f2   :  { %1531 = vmatprep.subr.bf16.mxu1 %v1811_v0  ;;  %1540 = vmatprep.subr.bf16.mxu0 %v1811_v0 }
 0x6f3   :  { %1434 = vmatprep.mubr.msk.f32.mxu0 %vm1812_vm0, %v1813_v1 }
 0x6f5   :  { %1533 = vmatpush3.bf16.msra.mxu1 %v2023_v60  ;;  %1542 = vmatpush3.bf16.msra.mxu0 %v1965_v14 }
 0x6f6   :  { %1534 = vmatprep.subr.bf16.mxu1 %v1811_v0  ;;  %1543 = vmatprep.subr.bf16.mxu0 %v1811_v0 }
 0x6f9   :  { %1536 = vmatpush3.bf16.msra.mxu1 %v2028_v2  ;;  %1545 = vmatpush3.bf16.msra.mxu0 %v1971_v17 }
 0x6fa   :  { %1546 = vmatprep.subr.bf16.mxu0 %v1811_v0  ;;  %1549 = vmatprep.subr.bf16.mxu1 %v1811_v0 }
 0x6fd   :  { %1548 = vmatpush3.bf16.msra.mxu0 %v1976_v23 }
 0x7bf   :  { %v697_v10 = vpop.f32.mrb[4].mxu1 }
 0x7c0   :  { %v698_v59 = vadd.f32 %v2062_v11, %v697_v10  ;;  %v1379_v61 = vpop.f32.mrb[5].mxu1 }
 0x7c2   :  { %v1197_v62 = vmul.f32 -1.442695, %v698_v59 }
 0x7c3   :  { %v801_v14 = vpop.f32.mrb[6].mxu0 }
 0x7c4   :  { %1599 = vpow2.f32 %v1197_v62  ;;  %v802_v63 = vadd.f32 %v801_v14, %v2002_v35  ;;  %v1398_v3 = vpop.f32.mrb[7].mxu0 }
 0x7c6   :  { %v1199_v4 = vmul.f32 -1.442695, %v802_v63 }
 0x7c8   :  { %1601 = vpow2.f32 %v1199_v4 }
 0x7c9   :  { %1603 = vtanh.f32 %v698_v59 }
 0x7ce   :  { %v1600_v5 = vpop.eup %1599 }
 0x7cf   :  { %v705_v17 = vadd.f32 1.0, %v1600_v5 }
 0x7d1   :  { %1605 = vrcp.f32 %v705_v17 }
 0x7d2   :  { %v1602_v6 = vpop.eup %1601  ;;  %1607 = vtanh.f32 %v802_v63 }
 0x7d3   :  { %v809_v7 = vadd.f32 1.0, %v1602_v6  ;;  %v1604_v23 = vpop.eup %1603 }
 0x7d5   :  { %1609 = vrcp.f32 %v809_v7 }
 0x7db   :  { %v1606_v8 = vpop.eup %1605 }
 0x7dc   :  { %v708_v9 = vsel %vm2005_vm6, %v1604_v23, %v1606_v8  ;;  %v1608_v12 = vpop.eup %1607 }
 0x7dd   :  { %711 = vrot.lane.b32.xlu0 %v708_v9, %s1814_s3  ;;  %v709_v21 = vmul.f32 %v708_v9, %v2075_v41 }
 0x7df   :  { %v1610_v13 = vpop.eup %1609 }
 0x7e0   :  { %v812_v15 = vsel %vm2005_vm6, %v1608_v12, %v1610_v13 }
 0x7e1   :  { %815 = vrot.lane.b32.xlu1 %v812_v15, %s1814_s3  ;;  %v813_v25 = vmul.f32 %v812_v15, %v2077_v44 }
 0x84f   :  { %v712_v16 = vpop.permute.xlu0 %711 }
 0x850   :  { %v714_v18 = vmul.f32 %v712_v16, %v708_v9 }
 0x852   :  { %716 = vrot.lane.b32.xlu0 %v714_v18, %s1815_s6 }
 0x853   :  { %v816_v19 = vpop.permute.xlu1 %815 }
 0x854   :  { %v818_v20 = vmul.f32 %v816_v19, %v812_v15 }
 0x856   :  { %820 = vrot.lane.b32.xlu1 %v818_v20, %s1815_s6 }
 0x8c4   :  { %v717_v22 = vpop.permute.xlu0 %716 }
 0x8c5   :  { %v2123_v24 = vadd.f32 %v717_v22, %v709_v21 }
 0x8c7   :  { %1611 = vtanh.f32 %v2123_v24 }
 0x8c8   :  { %v821_v26 = vpop.permute.xlu1 %820 }
 0x8c9   :  { %v2127_v27 = vadd.f32 %v821_v26, %v813_v25 }
 0x8cb   :  { %1613 = vtanh.f32 %v2127_v27 }
 0x8d1   :  { %v1612_v28 = vpop.eup %1611 }
 0x8d2   :  { %722 = vrot.lane.b32.xlu0 %v1612_v28, %s1814_s3 }
 0x8d5   :  { %v1614_v29 = vpop.eup %1613 }
 0x8d6   :  { %826 = vrot.lane.b32.xlu1 %v1614_v29, %s1814_s3 }
 0x944   :  { %v723_v30 = vpop.permute.xlu0 %722 }
 0x945   :  { %v2132_v31 = vmul.f32 %v723_v30, %v708_v9 }
 0x947   :  { %835 = vrot.lane.b32.xlu1 %v2132_v31, %s1814_s3 }
 0x948   :  { %v827_v32 = vpop.permute.xlu1 %826 }
 0x949   :  { %v829_v33 = vmul.f32 %v827_v32, %v812_v15 }
 0x94b   :  { %831 = vrot.lane.b32.xlu0 %v829_v33, %s1815_s6 }
 0x94f   :  { %939 = vrot.lane.b32.xlu0 %v829_v33, %s1814_s3 }
 0x9b9   :  { %v836_v34 = vpop.permute.xlu1 %835 }
 0x9bd   :  { %v832_v36 = vpop.permute.xlu0 %831 }
 0x9be   :  { %v838_v37 = vsel %vm209_vm2, %v832_v36, %v836_v34 }
 0x9bf   :  { %1416 = vmatmul.mubr.msk.f32.vlgmr.msra.gmra.mrb[6].mxu1 %vm298_vm3, %v838_v37 }
 0x9c0   :  { %1551 = vmatpush3.bf16.msra.mxu1 %v2016_v55  ;;  %1453 = vmatprep.mubr.msk.f32.mxu1 %vm1812_vm0, %v1813_v1 }
 0x9c1   :  { %v940_v39 = vpop.permute.xlu0 %939  ;;  %1552 = vmatprep.subr.bf16.mxu1 %v1811_v0 }
 0x9c2   :  { %v942_v40 = vsel %vm209_vm2, %v938_v38, %v940_v39 }
 0x9c3   :  { %1435 = vmatmul.mubr.msk.f32.vlgmr.msra.gmra.mrb[8].mxu0 %vm298_vm3, %v942_v40 }
 0x9c4   :  { %1554 = vmatpush3.bf16.msra.mxu1 %v2019_v57 }
 0x9c5   :  { %1555 = vmatprep.subr.bf16.mxu1 %v1811_v0 }
 0x9c8   :  { %1557 = vmatpush3.bf16.msra.mxu1 %v2023_v60 }
 0x9c9   :  { %1558 = vmatprep.subr.bf16.mxu1 %v1811_v0 }
 0x9cc   :  { %1560 = vmatpush3.bf16.msra.mxu1 %v2028_v2 }
 0xa92   :  { %v908_v55 = vpop.f32.mrb[6].mxu1 }
 0xa93   :  { %v909_v1 = vadd.f32 %v2062_v11, %v908_v55  ;;  %v1417_v41 = vpop.f32.mrb[7].mxu1 }
 0xa95   :  { %v1201_v42 = vmul.f32 -1.442695, %v909_v1 }
 0xa96   :  { %v1012_v44 = vpop.f32.mrb[8].mxu0 }
 0xa97   :  { %1615 = vpow2.f32 %v1201_v42  ;;  %v1013_v45 = vadd.f32 %v1012_v44, %v2002_v35  ;;  %v1436_v46 = vpop.f32.mrb[9].mxu0 }
 0xa99   :  { %v1203_v47 = vmul.f32 -1.442695, %v1013_v45 }
 0xa9b   :  { %1617 = vpow2.f32 %v1203_v47 }
 0xa9c   :  { %1619 = vtanh.f32 %v909_v1 }
 0xaa1   :  { %v1616_v57 = vpop.eup %1615 }
 0xaa2   :  { %v916_v49 = vadd.f32 1.0, %v1616_v57 }
 0xaa4   :  { %1621 = vrcp.f32 %v916_v49 }
 0xaa5   :  { %v1618_v60 = vpop.eup %1617  ;;  %1623 = vtanh.f32 %v1013_v45 }
 0xaa6   :  { %v1020_v0 = vadd.f32 1.0, %v1618_v60  ;;  %v1620_v2 = vpop.eup %1619 }
 0xaa8   :  { %1625 = vrcp.f32 %v1020_v0 }
 0xaae   :  { %v1622_v50 = vpop.eup %1621 }
 0xaaf   :  { %v919_v51 = vsel %vm2005_vm6, %v1620_v2, %v1622_v50  ;;  %v1624_v52 = vpop.eup %1623 }
 0xab0   :  { %922 = vrot.lane.b32.xlu1 %v919_v51, %s1814_s3  ;;  %v920_v59 = vmul.f32 %v919_v51, %v2123_v24 }
 0xab2   :  { %v1626_v35 = vpop.eup %1625 }
 0xab3   :  { %v1023_v53 = vsel %vm2005_vm6, %v1624_v52, %v1626_v35 }
 0xab4   :  { %1026 = vrot.lane.b32.xlu0 %v1023_v53, %s1814_s3  ;;  %v1024_v14 = vmul.f32 %v1023_v53, %v2127_v27 }
 0xb22   :  { %v923_v54 = vpop.permute.xlu1 %922 }
 0xb23   :  { %v925_v56 = vmul.f32 %v923_v54, %v919_v51 }
 0xb25   :  { %927 = vrot.lane.b32.xlu1 %v925_v56, %s1815_s6 }
 0xb26   :  { %v1027_v58 = vpop.permute.xlu0 %1026 }
 0xb27   :  { %v1029_v10 = vmul.f32 %v1027_v58, %v1023_v53 }
 0xb29   :  { %1031 = vrot.lane.b32.xlu0 %v1029_v10, %s1815_s6 }
 0xb97   :  { %v928_v61 = vpop.permute.xlu1 %927 }
 0xb98   :  { %v930_v62 = vadd.f32 %v928_v61, %v920_v59 }
 0xb9a   :  { %1627 = vtanh.f32 %v930_v62 }
 0xb9b   :  { %v1032_v63 = vpop.permute.xlu0 %1031 }
 0xb9c   :  { %v1034_v3 = vadd.f32 %v1032_v63, %v1024_v14 }
 0xb9e   :  { %1629 = vtanh.f32 %v1034_v3 }
 0xba4   :  { %v1628_v4 = vpop.eup %1627 }
 0xba5   :  { %933 = vrot.lane.b32.xlu1 %v1628_v4, %s1814_s3 }
 0xba8   :  { %v1630_v5 = vpop.eup %1629 }
 0xba9   :  { %1037 = vrot.lane.b32.xlu0 %v1630_v5, %s1814_s3 }
 0xc17   :  { %v934_v17 = vpop.permute.xlu1 %933 }
 0xc18   :  { %v936_v6 = vmul.f32 %v934_v17, %v919_v51 }
 0xc1a   :  { %1046 = vrot.lane.b32.xlu0 %v936_v6, %s1814_s3 }
 0xc1b   :  { %v1038_v7 = vpop.permute.xlu0 %1037 }
 0xc1c   :  { %v1040_v23 = vmul.f32 %v1038_v7, %v1023_v53 }
 0xc1e   :  { %1042 = vrot.lane.b32.xlu1 %v1040_v23, %s1815_s6 }
 0xc8c   :  { %v1047_v8 = vpop.permute.xlu0 %1046 }
 0xc90   :  { %v1043_v9 = vpop.permute.xlu1 %1042 }
 0xc91   :  { %v1049_v12 = vsel %vm209_vm2, %v1043_v9, %v1047_v8 }
 0xc92   :  { %1454 = vmatmul.mubr.msk.f32.vlgmr.msra.gmra.mrb[8].mxu1 %vm298_vm3, %v1049_v12 }
 0xd65   :  { %v1119_v13 = vpop.f32.mrb[8].mxu1 }
 0xd66   :  { %v1120_v15 = vadd.f32 %v2062_v11, %v1119_v13  ;;  %v1455_v16 = vpop.f32.mrb[9].mxu1 }
 0xd68   :  { %v1205_v18 = vmul.f32 -1.442695, %v1120_v15 }
 0xd6a   :  { %1631 = vpow2.f32 %v1205_v18 }
 0xd6b   :  { %1633 = vtanh.f32 %v1120_v15 }
 0xd74   :  { %v1632_v19 = vpop.eup %1631 }
 0xd75   :  { %v1127_v20 = vadd.f32 1.0, %v1632_v19  ;;  %v1634_v21 = vpop.eup %1633 }
 0xd77   :  { %1635 = vrcp.f32 %v1127_v20 }
 0xd81   :  { %v1636_v22 = vpop.eup %1635 }
 0xd82   :  { %v1130_v24 = vsel %vm2005_vm6, %v1634_v21, %v1636_v22 }
 0xd83   :  { %1133 = vrot.lane.b32.xlu1 %v1130_v24, %s1814_s3  ;;  %v1131_v11 = vmul.f32 %v1130_v24, %v930_v62 }
 0xdf5   :  { %v1134_v25 = vpop.permute.xlu1 %1133 }
 0xdf6   :  { %v1136_v26 = vmul.f32 %v1134_v25, %v1130_v24 }
 0xdf8   :  { %1138 = vrot.lane.b32.xlu0 %v1136_v26, %s1815_s6 }
 0xdfc   :  { %1149 = vrot.lane.b32.xlu0 %v2083_v48, %s1815_s6 }
 0xe00   :  { %1153 = vrot.lane.b32.xlu0 %v936_v6, %s1815_s6 }
 0xe6a   :  { %v1139_v27 = vpop.permute.xlu0 %1138 }
 0xe6b   :  { %v1141_v28 = vadd.f32 %v1139_v27, %v1131_v11 }
 0xe6d   :  { %1637 = vtanh.f32 %v1141_v28 }
 0xe6e   :  { %v1150_v29 = vpop.permute.xlu0 %1149 }
 0xe6f   :  { %1161 = vst.msk [vmem:[#allocation13] sm:$0xff] %vm209_vm2, %v1150_v29 }
 0xe72   :  { %v1154_v43 = vpop.permute.xlu0 %1153 }
 0xe73   :  { %1163 = vst.msk [vmem:[#allocation13 + $0x10] sm:$0xff] %vm209_vm2, %v1154_v43 }
 0xe77   :  { %v1638_v30 = vpop.eup %1637 }
 0xe78   :  { %1144 = vrot.lane.b32.xlu1 %v1638_v30, %s1814_s3 }
 0xe7c   :  { %1151 = vrot.lane.b32.xlu1 %v2132_v31, %s1815_s6 }
 0xeea   :  { %v1145_v32 = vpop.permute.xlu1 %1144 }
 0xeeb   :  { %v1147_v48 = vmul.f32 %v1145_v32, %v1130_v24 }
 0xeed   :  { %1155 = vrot.lane.b32.xlu1 %v1147_v48, %s1815_s6 }
 0xeee   :  { %v1152_v33 = vpop.permute.xlu1 %1151 }
 0xeef   :  { %1162 = vst.msk [vmem:[#allocation13 + $0x8] sm:$0xff] %vm209_vm2, %v1152_v33 }
 0xf5f   :  { %v1156_v34 = vpop.permute.xlu1 %1155 }
 0xf60   :  { %1164 = vst.msk [vmem:[#allocation13 + $0x18] sm:$0xff] %vm209_vm2, %v1156_v34 }
 0xf61   :  { %1782 = shalt.err (!%p1779_p10)
}
 0xf62   :  { %s1783_s24 = scalar_lea.hbm %s2209_s9, 512 }
 0xf63   :  { %p1784_p11 = scmp.ne.s32.totalorder %s2209_s9, %s1783_s24  ;;  %p1787_p12 = scmp.lt.u32.totalorder %s1783_s24, %s2209_s9 }
 0xf65   :  { %p1789_p13 = pnand %p1787_p12, %p1784_p11 }
 0xf67   :  { %1792 = shalt.err (!%p1789_p13)
}
 0xf68   :  { %1176 = dma.vmem_to_hbm [thread:$0]  %s1171_s22, 512, %s2209_s9, [#allocation4], %s1804_s19, %s1804_s19, %s1805_s20  }
 0xf69   :  { %1801 = dma.done.wait [#allocation4], 512  }
 0xf6a   :  { %1802 = vsyncadd [#allocation4], 4294966784 }
 0xf6b   :  { %1180 = vsyncpa [#allocation3], 1 }
 0xf6c   :  { %1181 = vsyncpa [#allocation6], 1 }
 0xf6d   :  { %1182 = vsyncpa [#allocation9], 1 }
 0xf6e   :  { %1183 = vsyncpa [#allocation12], 1 }
 0xf6f   :  { %1184 = vsyncpa [#allocation4], 1 }

</bundles_post_ra>
